<compile_context>
chip_gen: v5e
topology: v5e:2x2
jax: 0.10.0
libtpu: 0.0.40
codegen_flags: <defaults>
</compile_context>

<pallas_src>
import math

import jax
import jax.numpy as jnp
from jax import lax
from jax.experimental import pallas as pl
from jax.experimental.pallas import tpu as pltpu


def valuenet_kernel(x_ref, w1T_ref, b1_ref, w2T_ref, b2_ref, out_ref):
    # hT[h, b] = sum_s W1ᵀ[h, s] * x[b, s]  — contract the K=4 state axis of
    # both operands; hidden lands on sublanes, batch on lanes: (H, tb).
    h = lax.dot_general(
        w1T_ref[...], x_ref[...],
        dimension_numbers=(((1,), (1,)), ((), ())),
        preferred_element_type=jnp.float32,
    )
    h = jnp.maximum(h + b1_ref[...], 0.0)          # (H, tb)
    # outᵀ = W2ᵀ · hT + b2  ->  (1, tb), lane-dense store.
    out_ref[...] = (
        jnp.dot(w2T_ref[...], h, preferred_element_type=jnp.float32) + b2_ref[0]
    )


def value_net_forward(x, w1, b1, w2, b2, *, tb_max=16384):
    """x: (B, state_dim) f32; w1: (state_dim, H); b1: (H,); w2: (H, 1); b2: (1,).

    Returns (B, 1) f32, identical to fc2(relu(fc1(x))).
    """
    B, S = x.shape
    H = w1.shape[1]

    # Tile selection: sized by the (H, tb) f32 hidden intermediate (512*tb B),
    # capped so it fits the 40 MiB scoped-VMEM budget on every generation,
    # while keeping >=4 grid steps for moderate batches (megacore occupancy).
    if B <= 1024:
        tb = B                                   # single step; full-dim block is always legal
    else:
        tb = min(tb_max, pl.cdiv(pl.cdiv(B, 4), 128) * 128)
    grid = (pl.cdiv(B, tb),)

    # Tiny, one-time weight relayouts (512 floats total).
    w1T = w1.T.astype(jnp.float32)               # (H, S)  resident
    b1c = b1.reshape(H, 1).astype(jnp.float32)   # (H, 1)  column bias (lane-broadcast)
    w2T = w2.reshape(H, 1).T.astype(jnp.float32)  # (1, H)  resident
    b2s = b2.reshape(1).astype(jnp.float32)      # (1,)    scalar -> SMEM

    outT = pl.pallas_call(
        valuenet_kernel,
        out_shape=jax.ShapeDtypeStruct((1, B), jnp.float32),
        grid=grid,
        in_specs=[
            pl.BlockSpec((tb, S), lambda i: (i, 0)),    # x: batch-tiled, ragged tail OK
            pl.BlockSpec((H, S), lambda i: (0, 0)),     # W1ᵀ: resident
            pl.BlockSpec((H, 1), lambda i: (0, 0)),     # b1:  resident
            pl.BlockSpec((1, H), lambda i: (0, 0)),     # W2ᵀ: resident
            pl.BlockSpec(memory_space=pltpu.MemorySpace.SMEM),  # b2 scalar
        ],
        out_specs=pl.BlockSpec((1, tb), lambda i: (0, i)),
        compiler_params=pltpu.CompilerParams(
            dimension_semantics=("parallel",),
            vmem_limit_bytes=40 * 1024 * 1024,
        ),
    )(x.astype(jnp.float32), w1T, b1c, w2T, b2s)

    # (1, B) -> (B, 1): transpose of a dim-1 axis is a free reshape.
    return outT.T


def init_params(key, state_dim, hidden_dim):
    """Deterministic init mimicking torch.nn.Linear default (U[-1/sqrt(fan_in), ...])."""
    k1, k2, k3, k4 = jax.random.split(key, 4)
    bound1 = 1.0 / math.sqrt(state_dim)
    bound2 = 1.0 / math.sqrt(hidden_dim)
    # weights stored (in, out); the wrapper transposes into the resident layout
    w1 = jax.random.uniform(k1, (state_dim, hidden_dim), jnp.float32, -bound1, bound1)
    b1 = jax.random.uniform(k2, (hidden_dim,), jnp.float32, -bound1, bound1)
    w2 = jax.random.uniform(k3, (hidden_dim, 1), jnp.float32, -bound2, bound2)
    b2 = jax.random.uniform(k4, (1,), jnp.float32, -bound2, bound2)
    return w1, b1, w2, b2


def _reference(x, w1, b1, w2, b2):
    return jnp.maximum(x @ w1 + b1.reshape(1, -1), 0.0) @ w2 + b2.reshape(1, 1)


if __name__ == "__main__":
    state_dim = 4      # CartPole-v0 observation dim
    hidden_dim = 128
    batch = 8

    key = jax.random.PRNGKey(0)
    kx, kp, kx2 = jax.random.split(key, 3)
    x = jax.random.normal(kx, (batch, state_dim), jnp.float32)
    w1, b1, w2, b2 = init_params(kp, state_dim, hidden_dim)

    # Small CartPole-sized batch: single grid step.
    out = value_net_forward(x, w1, b1, w2, b2)
    out = jax.block_until_ready(out)
    ref = _reference(x, w1, b1, w2, b2)
    assert out.shape == (batch, 1)
    assert jnp.allclose(out, ref, atol=1e-5, rtol=1e-5)

    # Larger, non-divisible batch: exercises the multi-step grid + ragged tail.
    x2 = jax.random.normal(kx2, (2500, state_dim), jnp.float32)
    out2 = jax.block_until_ready(value_net_forward(x2, w1, b1, w2, b2))
    ref2 = _reference(x2, w1, b1, w2, b2)
    assert out2.shape == (2500, 1)
    assert jnp.allclose(out2, ref2, atol=1e-5, rtol=1e-5)

    print("KERNEL_OK")
</pallas_src>

<mosaic_0001>
module attributes {stable_mosaic.version = 11 : i64} {
  func.func @valuenet_kernel(%arg0: i32, %arg1: memref<8x4xf32, #tpu.memory_space<vmem>>, %arg2: memref<128x4xf32, #tpu.memory_space<vmem>>, %arg3: memref<128x1xf32, #tpu.memory_space<vmem>>, %arg4: memref<1x128xf32, #tpu.memory_space<vmem>>, %arg5: memref<1xf32, #tpu.memory_space<smem>>, %arg6: memref<1x8xf32, #tpu.memory_space<vmem>>) attributes {dimension_semantics = [#tpu.dimension_semantics<parallel>], iteration_bounds = array<i64: 1>, scalar_prefetch = 0 : i64, scratch_operands = 0 : i64, tpu.core_type = #tpu.core_type<tc>, window_params = [{transform_indices = @transform_0, window_bounds = array<i64: 8, 4>}, {pipeline_mode = #tpu.pipeline_mode<synchronous>, transform_indices = @transform_1, window_bounds = array<i64: 128, 4>}, {pipeline_mode = #tpu.pipeline_mode<synchronous>, transform_indices = @transform_2, window_bounds = array<i64: 128, 1>}, {pipeline_mode = #tpu.pipeline_mode<synchronous>, transform_indices = @transform_3, window_bounds = array<i64: 1, 128>}, {transform_indices = @transform_4, window_bounds = array<i64: 1>}, {transform_indices = @transform_5, window_bounds = array<i64: 1, 8>}]} {
    %c0 = arith.constant 0 : index
    %c0_0 = arith.constant 0 : index
    %0 = vector.load %arg2[%c0, %c0_0] : memref<128x4xf32, #tpu.memory_space<vmem>>, vector<128x4xf32>
    %c0_1 = arith.constant 0 : index
    %c0_2 = arith.constant 0 : index
    %1 = vector.load %arg1[%c0_1, %c0_2] : memref<8x4xf32, #tpu.memory_space<vmem>>, vector<8x4xf32>
    %cst = arith.constant dense<0.000000e+00> : vector<128x8xf32>
    %2 = tpu.matmul %0, %1, %cst {dimension_numbers = #tpu.dot_dimension_numbers<[1], [1], [0], [0], [0, 0, 1, 0], [], []>} : vector<128x4xf32>, vector<8x4xf32>, vector<128x8xf32> -> vector<128x8xf32>
    %c0_3 = arith.constant 0 : index
    %c0_4 = arith.constant 0 : index
    %3 = vector.load %arg3[%c0_3, %c0_4] : memref<128x1xf32, #tpu.memory_space<vmem>>, vector<128x1xf32>
    %4 = vector.broadcast %3 : vector<128x1xf32> to vector<128x8xf32>
    %5 = arith.addf %2, %4 : vector<128x8xf32>
    %cst_5 = arith.constant 0.000000e+00 : f32
    %6 = vector.broadcast %cst_5 : f32 to vector<128x8xf32>
    %7 = arith.maximumf %5, %6 : vector<128x8xf32>
    %c0_6 = arith.constant 0 : index
    %c0_7 = arith.constant 0 : index
    %8 = vector.load %arg4[%c0_6, %c0_7] : memref<1x128xf32, #tpu.memory_space<vmem>>, vector<1x128xf32>
    %cst_8 = arith.constant dense<0.000000e+00> : vector<1x8xf32>
    %9 = tpu.matmul %8, %7, %cst_8 {dimension_numbers = #tpu.dot_dimension_numbers<[1], [0], [0], [1], [0, 0, 1, 1], [], []>} : vector<1x128xf32>, vector<128x8xf32>, vector<1x8xf32> -> vector<1x8xf32>
    %c0_9 = arith.constant 0 : index
    %10 = memref.load %arg5[%c0_9] : memref<1xf32, #tpu.memory_space<smem>>
    %11 = vector.broadcast %10 : f32 to vector<1x8xf32>
    %12 = arith.addf %9, %11 : vector<1x8xf32>
    %c0_10 = arith.constant 0 : index
    %c0_11 = arith.constant 0 : index
    %13 = vector.load %arg6[%c0_10, %c0_11] : memref<1x8xf32, #tpu.memory_space<vmem>>, vector<1x8xf32>
    tpu.vector_store %arg6[%c0_10, %c0_11], %12 {strides = array<i32>} : memref<1x8xf32, #tpu.memory_space<vmem>>, vector<1x8xf32>,
    return
  }
  func.func @transform_0(%arg0: i32) -> (i32, i32) {
    %c0_i32 = arith.constant 0 : i32
    %c0_i32_0 = arith.constant 0 : i32
    return %arg0, %c0_i32 : i32, i32
  }
  func.func @transform_1(%arg0: i32) -> (i32, i32) {
    %c0_i32 = arith.constant 0 : i32
    %c0_i32_0 = arith.constant 0 : i32
    %c0_i32_1 = arith.constant 0 : i32
    return %c0_i32, %c0_i32_0 : i32, i32
  }
  func.func @transform_2(%arg0: i32) -> (i32, i32) {
    %c0_i32 = arith.constant 0 : i32
    %c0_i32_0 = arith.constant 0 : i32
    %c0_i32_1 = arith.constant 0 : i32
    return %c0_i32, %c0_i32_0 : i32, i32
  }
  func.func @transform_3(%arg0: i32) -> (i32, i32) {
    %c0_i32 = arith.constant 0 : i32
    %c0_i32_0 = arith.constant 0 : i32
    %c0_i32_1 = arith.constant 0 : i32
    return %c0_i32, %c0_i32_0 : i32, i32
  }
  func.func @transform_4(%arg0: i32) -> i32 {
    %c0_i32 = arith.constant 0 : i32
    %c0_i32_0 = arith.constant 0 : i32
    return %c0_i32 : i32
  }
  func.func @transform_5(%arg0: i32) -> (i32, i32) {
    %c0_i32 = arith.constant 0 : i32
    %c0_i32_0 = arith.constant 0 : i32
    return %c0_i32, %arg0 : i32, i32
  }
}

</mosaic_0001>

<bundles_post_ra>
// kernel: tpu_custom_call.1
= control target key start
LH: loop header
LB: loop body
LE: loop exit
PB: predicated region body
PF: predicated region fallthrough
CT: control target
= control target key end

     0   :  { %vm135_vm0 = vcmask 31744   ;;  %v359_v3 = vmov 0   ;;  %s521_s0 = inlined_call_operand.vmem [shape: f32[8,4], index: 0, kind: input, shape index: {}]   ;;  %s522_s1 = inlined_call_operand.vmem [shape: f32[128,4], index: 1, kind: input, shape index: {}]   ;;  %s523_s2 = inlined_call_operand.vmem [shape: f32[128,1], index: 2, kind: input, shape index: {}]   ;;  %s524_s3 = inlined_call_operand.vmem [shape: f32[1,128], index: 3, kind: input, shape index: {}]   ;;  %s525_s4 = inlined_call_operand.<no memory space> [shape: f32[1], index: 4, kind: input, shape index: {}]   ;;  %s526_s5 = inlined_call_operand.hbm [shape: f32[1,8], index: 5, kind: output, shape index: {}]  }
   0x1   :  { %v38_v0 = vld [vmem:[%s521_s0] sm:$0xff]  ;;  %v52_v1 = vld [vmem:[%s523_s2 + $0x68] sm:$0xff]  ;;  %v54_v2 = vld [vmem:[%s523_s2 + $0x78] sm:$0xff]  ;;  %331 = vset.pattern.permute.xlu1 %v359_v3  ;;  %330 = vset.pattern.permute.xlu0 %v359_v3 }
   0x2   :  { %326 = vmatpush.xpose.msk.msra.mxu2 %vm135_vm0, %v38_v0  ;;  %v27_v4 = vld [vmem:[%s522_s1 + $0x28] sm:$0xff]  ;;  %327 = vmatpush.xpose.msk.msra.mxu3 %vm135_vm0, %v38_v0  ;;  %v33_v5 = vld [vmem:[%s522_s1 + $0x58] sm:$0xff]  ;;  %v22_v6 = vld [vmem:[%s522_s1] sm:$0xff] }
   0x3   :  { %122 = vperm.xlu1 %331, %v52_v1   ;;  %132 = vperm.xlu0 %330, %v54_v2   ;;  %v51_v7 = vld [vmem:[%s523_s2 + $0x60] sm:$0xff]  ;;  %v53_v8 = vld [vmem:[%s523_s2 + $0x70] sm:$0xff]  ;;  %v50_v9 = vld [vmem:[%s523_s2 + $0x58] sm:$0xff] }
   0x4   :  { %309 = vmatpush.xpose.msk.msra.mxu0 %vm135_vm0, %v38_v0  ;;  %332 = vset.pattern.permute.xlu2 %v359_v3  ;;  %v28_v10 = vld [vmem:[%s522_s1 + $0x30] sm:$0xff] }
   0x5   :  { %315 = vmatmul.msk.f32.vlgmr.msra.gmra.mxu2 %vm135_vm0, %v27_v4  ;;  %321 = vmatmul.msk.f32.vlgmr.msra.gmra.mxu3 %vm135_vm0, %v33_v5 }
   0x6   :  { %112 = vperm.xlu2 %332, %v50_v9  }
   0x7   :  { %310 = vmatmul.msk.f32.vlgmr.msra.gmra.mxu0 %vm135_vm0, %v22_v6 }
   0x8   :  { %11 = vsyncpa [#allocation4], 0  ;;  %v34_v11 = vld [vmem:[%s522_s1 + $0x60] sm:$0xff]  ;;  %v23_v12 = vld [vmem:[%s522_s1 + $0x8] sm:$0xff]  ;;  %s360_s8 = smov [#allocation3]   ;;  %s300_s12 = sshll.u32 %s526_s5, 4  ;;  %s301_s12 = int_to_ptr.hbm [resolvable:$true] %s300_s12 }
   0x9   :  { %v49_v13 = vld [vmem:[%s523_s2 + $0x50] sm:$0xff]  ;;  %v47_v14 = vld [vmem:[%s523_s2 + $0x40] sm:$0xff]  ;;  %v48_v15 = vld [vmem:[%s523_s2 + $0x48] sm:$0xff]  ;;  %s298_s9 = sshll.u32 %s360_s8, 4  ;;  %vm291_vm1 = vcmask 57344   ;;  %s299_s9 = int_to_ptr.vmem [resolvable:$true] %s298_s9 }
   0xa   :  { %v29_v16 = vld [vmem:[%s522_s1 + $0x38] sm:$0xff]  ;;  %v35_v17 = vld [vmem:[%s522_s1 + $0x68] sm:$0xff]  ;;  %v24_v18 = vld [vmem:[%s522_s1 + $0x10] sm:$0xff] }
   0xb   :  { %117 = vperm.xlu1 %331, %v51_v7   ;;  %127 = vperm.xlu0 %330, %v53_v8   ;;  %v46_v19 = vld [vmem:[%s523_s2 + $0x38] sm:$0xff]  ;;  %v44_v20 = vld [vmem:[%s523_s2 + $0x28] sm:$0xff]  ;;  %v45_v21 = vld [vmem:[%s523_s2 + $0x30] sm:$0xff] }
   0xc   :  { %v30_v22 = vld [vmem:[%s522_s1 + $0x40] sm:$0xff]  ;;  %v36_v23 = vld [vmem:[%s522_s1 + $0x70] sm:$0xff]  ;;  %v25_v24 = vld [vmem:[%s522_s1 + $0x18] sm:$0xff] }
   0xd   :  { %316 = vmatmul.msk.f32.gmra.mxu2 %vm135_vm0, %v28_v10  ;;  %322 = vmatmul.msk.f32.gmra.mxu3 %vm135_vm0, %v34_v11  ;;  %v43_v25 = vld [vmem:[%s523_s2 + $0x20] sm:$0xff]  ;;  %v42_v26 = vld [vmem:[%s523_s2 + $0x18] sm:$0xff]  ;;  %v41_v27 = vld [vmem:[%s523_s2 + $0x10] sm:$0xff] }
   0xe   :  { %107 = vperm.xlu2 %332, %v49_v13   ;;  %v31_v28 = vld [vmem:[%s522_s1 + $0x48] sm:$0xff]  ;;  %v37_v29 = vld [vmem:[%s522_s1 + $0x78] sm:$0xff]  ;;  %v26_v30 = vld [vmem:[%s522_s1 + $0x20] sm:$0xff] }
   0xf   :  { %311 = vmatmul.msk.f32.gmra.mxu0 %vm135_vm0, %v23_v12  ;;  %v40_v31 = vld [vmem:[%s523_s2 + $0x8] sm:$0xff]  ;;  %v39_v32 = vld [vmem:[%s523_s2] sm:$0xff]  ;;  %v32_v33 = vld [vmem:[%s522_s1 + $0x50] sm:$0xff] }
  0x13   :  { %97 = vperm.xlu1 %331, %v47_v14   ;;  %102 = vperm.xlu0 %330, %v48_v15  }
  0x15   :  { %317 = vmatmul.msk.f32.gmra.mxu2 %vm135_vm0, %v29_v16  ;;  %323 = vmatmul.msk.f32.gmra.mxu3 %vm135_vm0, %v35_v17 }
  0x16   :  { %92 = vperm.xlu2 %332, %v46_v19  }
  0x17   :  { %312 = vmatmul.msk.f32.gmra.mxu0 %vm135_vm0, %v24_v18 }
  0x1b   :  { %82 = vperm.xlu1 %331, %v44_v20   ;;  %87 = vperm.xlu0 %330, %v45_v21  }
  0x1d   :  { %318 = vmatmul.msk.f32.gmra.mxu2 %vm135_vm0, %v30_v22  ;;  %324 = vmatmul.msk.f32.gmra.mxu3 %vm135_vm0, %v36_v23 }
  0x1e   :  { %77 = vperm.xlu2 %332, %v43_v25  }
  0x1f   :  { %313 = vmatmul.msk.f32.gmra.mxu0 %vm135_vm0, %v25_v24 }
  0x23   :  { %72 = vperm.xlu0 %330, %v42_v26   ;;  %67 = vperm.xlu1 %331, %v41_v27  }
  0x25   :  { %319 = vmatmul.msk.f32.gmra.mxu2 %vm135_vm0, %v31_v28  ;;  %325 = vmatmul.msk.f32.gmra.mxu3 %vm135_vm0, %v37_v29 }
  0x26   :  { %62 = vperm.xlu2 %332, %v40_v31  }
  0x27   :  { %314 = vmatmul.msk.f32.gmra.mxu0 %vm135_vm0, %v26_v30 }
  0x2b   :  { %57 = vperm.xlu0 %330, %v39_v32  }
  0x2d   :  { %320 = vmatmul.msk.f32.gmra.mxu2 %vm135_vm0, %v32_v33 }
  0x60   :  { %v113_v40 = vpop.permute.xlu2 %112 }
  0x68   :  { %v108_v49 = vpop.permute.xlu2 %107 }
  0x70   :  { %v93_v59 = vpop.permute.xlu2 %92 }
  0x75   :  { %v133_v37 = vpop.permute.xlu0 %132  ;;  %v123_v42 = vpop.permute.xlu1 %122 }
  0x78   :  { %v78_v10 = vpop.permute.xlu2 %77 }
  0x7d   :  { %v128_v44 = vpop.permute.xlu0 %127  ;;  %v118_v48 = vpop.permute.xlu1 %117 }
  0x80   :  { %v63_v24 = vpop.permute.xlu2 %62 }
  0x84   :  { %v509_v39 = vpop.f32.mrf.mxu0 }
  0x85   :  { %v103_v50 = vpop.permute.xlu0 %102  ;;  %v98_v58 = vpop.permute.xlu1 %97 }
  0x88   :  { %v219_v34 = vpop.f32.mrf.mxu2  ;;  %v237_v35 = vpop.f32.mrf.mxu3 }
  0x89   :  { %v238_v63 = vadd.f32 %v237_v35, %v113_v40  ;;  %v270_v35 = vstv %s525_s4 }
  0x8b   :  { %v263_v5 = vmax.f32 %v238_v63, 0.0 }
  0x8c   :  { %v207_v45 = vpop.f32.mrf.mxu0 }
  0x8d   :  { %v88_v62 = vpop.permute.xlu0 %87  ;;  %v83_v9 = vpop.permute.xlu1 %82  ;;  %v208_v29 = vadd.f32 %v207_v45, %v63_v24 }
  0x8e   :  { %v220_v17 = vadd.f32 %v219_v34, %v83_v9  ;;  %v268_v34 = vld [vmem:[%s524_s3] sm:$0x1] }
  0x8f   :  { %v253_v32 = vmax.f32 %v208_v29, 0.0 }
  0x90   :  { %v222_v36 = vpop.f32.mrf.mxu2  ;;  %v240_v38 = vpop.f32.mrf.mxu3  ;;  %v257_v22 = vmax.f32 %v220_v17, 0.0 }
  0x91   :  { %v241_v60 = vadd.f32 %v240_v38, %v118_v48  ;;  %v223_v14 = vadd.f32 %v222_v36, %v88_v62 }
  0x93   :  { %v264_v3 = vmax.f32 %v241_v60, 0.0  ;;  %v258_v19 = vmax.f32 %v223_v14, 0.0 }
  0x94   :  { %v210_v51 = vpop.f32.mrf.mxu0 }
  0x95   :  { %v73_v13 = vpop.permute.xlu0 %72  ;;  %v68_v21 = vpop.permute.xlu1 %67 }
  0x96   :  { %v211_v25 = vadd.f32 %v210_v51, %v68_v21 }
  0x98   :  { %v225_v41 = vpop.f32.mrf.mxu2  ;;  %v243_v43 = vpop.f32.mrf.mxu3  ;;  %v254_v31 = vmax.f32 %v211_v25, 0.0 }
  0x99   :  { %v244_v56 = vadd.f32 %v243_v43, %v123_v42  ;;  %v226_v11 = vadd.f32 %v225_v41, %v93_v59 }
  0x9b   :  { %v265_v0 = vmax.f32 %v244_v56, 0.0  ;;  %v259_v18 = vmax.f32 %v226_v11, 0.0 }
  0x9c   :  { %v213_v2 = vpop.f32.mrf.mxu0 }
  0x9d   :  { %v214_v23 = vadd.f32 %v213_v2, %v73_v13  ;;  %v58_v27 = vpop.permute.xlu0 %57 }
  0x9e   :  { %v205_v30 = vadd.f32 %v509_v39, %v58_v27 }
  0x9f   :  { %v255_v28 = vmax.f32 %v214_v23, 0.0 }
  0xa0   :  { %v228_v46 = vpop.f32.mrf.mxu2  ;;  %v246_v47 = vpop.f32.mrf.mxu3  ;;  %v252_v33 = vmax.f32 %v205_v30, 0.0 }
  0xa1   :  { %v247_v54 = vadd.f32 %v246_v47, %v128_v44  ;;  %v229_v7 = vadd.f32 %v228_v46, %v98_v58 }
  0xa3   :  { %v266_v61 = vmax.f32 %v247_v54, 0.0  ;;  %v260_v15 = vmax.f32 %v229_v7, 0.0 }
  0xa4   :  { %v216_v16 = vpop.f32.mrf.mxu0 }
  0xa5   :  { %v217_v20 = vadd.f32 %v216_v16, %v78_v10 }
  0xa7   :  { %v256_v26 = vmax.f32 %v217_v20, 0.0 }
  0xa8   :  { %v231_v52 = vpop.f32.mrf.mxu2  ;;  %v249_v53 = vpop.f32.mrf.mxu3 }
  0xa9   :  { %v250_v55 = vadd.f32 %v249_v53, %v133_v37  ;;  %v232_v6 = vadd.f32 %v231_v52, %v103_v50 }
  0xab   :  { %v267_v57 = vmax.f32 %v250_v55, 0.0  ;;  %v261_v12 = vmax.f32 %v232_v6, 0.0 }
  0xad   :  { %271 = vmatpush.msra.mxu1 %v267_v57 }
  0xaf   :  { %272 = vmatpush.msra.mxu1 %v266_v61 }
  0xb0   :  { %v234_v1 = vpop.f32.mrf.mxu2 }
  0xb1   :  { %v235_v4 = vadd.f32 %v234_v1, %v108_v49  ;;  %273 = vmatpush.msra.mxu1 %v265_v0 }
  0xb3   :  { %274 = vmatpush.msra.mxu1 %v264_v3  ;;  %v262_v8 = vmax.f32 %v235_v4, 0.0 }
  0xb5   :  { %275 = vmatpush.msra.mxu1 %v263_v5 }
  0xb7   :  { %276 = vmatpush.msra.mxu1 %v262_v8 }
  0xb9   :  { %277 = vmatpush.msra.mxu1 %v261_v12 }
  0xbb   :  { %278 = vmatpush.msra.mxu1 %v260_v15 }
  0xbd   :  { %279 = vmatpush.msra.mxu1 %v259_v18 }
  0xbf   :  { %280 = vmatpush.msra.mxu1 %v258_v19 }
  0xc1   :  { %281 = vmatpush.msra.mxu1 %v257_v22 }
  0xc3   :  { %282 = vmatpush.msra.mxu1 %v256_v26 }
  0xc5   :  { %283 = vmatpush.msra.mxu1 %v255_v28 }
  0xc7   :  { %284 = vmatpush.msra.mxu1 %v254_v31 }
  0xc9   :  { %285 = vmatpush.msra.mxu1 %v253_v32 }
  0xcb   :  { %286 = vmatpush.msra.mxu1 %v252_v33 }
  0xcc   :  { %287 = vmatmul.f32.vlgmr.msra.gmra.mxu1 %v268_v34 }
 0x149   :  { %v288_v36 = vpop.f32.mrf.mxu1 }
 0x14a   :  { %v289_v37 = vadd.f32 %v288_v36, %v270_v35 }
 0x14c   :  { %292 = vst.msk [vmem:[#allocation3] sm:$0x1] %vm291_vm1, %v289_v37 }
 0x14d   :  { %303 = dma.vmem_to_hbm [thread:$0]  %s299_s9, 16, %s301_s12, [#allocation4]  }
 0x14e   :  { %357 = dma.done.wait [#allocation4], 16  }
 0x14f   :  { %358 = vsyncadd [#allocation4], 4294967280 }
 0x150   :  { %308 = vsyncpa [#allocation4], 1 }

</bundles_post_ra>
